<compile_context>
chip_gen: v7x
topology: tpu7x:2x2x1
jax: 0.10.0
libtpu: 0.0.40
codegen_flags: <defaults>
</compile_context>

<pallas_src>
import jax
import jax.numpy as jnp
from jax.experimental import pallas as pl
from jax.experimental.pallas import tpu as pltpu


# ---------------------------------------------------------------------------
# Primary path: zero-copy identity (output aliases input, nothing is moved).
# ---------------------------------------------------------------------------
def _id_alias_kernel(x_ref, o_ref):
    # Output buffer IS the input buffer (input_output_aliases={0: 0}), so the
    # values are already correct.  touch() pins a read+write dependency on the
    # aliased output so the custom call's ordering/result is well defined.
    pltpu.touch(o_ref)


def _id_alias(x):
    return pl.pallas_call(
        _id_alias_kernel,
        out_shape=jax.ShapeDtypeStruct(x.shape, x.dtype),
        in_specs=[pl.BlockSpec(memory_space=pl.ANY)],
        out_specs=pl.BlockSpec(memory_space=pl.ANY),
        input_output_aliases={0: 0},
        cost_estimate=pl.CostEstimate(
            flops=0, transcendentals=0, bytes_accessed=0),
    )(x)


# ---------------------------------------------------------------------------
# Fallback path: materialized lane-dense copy (previously validated kernel,
# retuned per the perf review).  Only used if the aliased path cannot lower.
# ---------------------------------------------------------------------------
def _copy_kernel(x_ref, o_ref):
    o_ref[...] = x_ref[...]


# Candidate lane widths (multiples of 128), widest first -> unmasked vld/vst.
_LANE_WIDTHS = (4096, 3072, 2048, 1536, 1024, 768, 512, 384, 256, 128)
# Per-tile VMEM budget (review: 6-8 MiB).  in+out, double-buffered = 24 MiB.
_TILE_BYTES_BUDGET = 6 * 1024 * 1024
_VMEM_LIMIT_BYTES = 48 * 1024 * 1024


def _sublane_multiple(dtype):
    # Native sublane packing: 8 for 4-byte, 16 for 2-byte, 32 for 1-byte types.
    itemsize = jnp.dtype(dtype).itemsize
    return max(8, 32 // max(itemsize, 1))


def _choose_cols(n):
    for c in _LANE_WIDTHS:
        if n % c == 0:
            return c
    return None


def _choose_row_tile(rows, sub, budget_rows):
    if rows <= budget_rows:
        return rows
    # Prefer a sublane-aligned divisor of rows (no masked partial edge block).
    r = budget_rows
    while r >= sub:
        if rows % r == 0:
            return r
        r -= sub
    return budget_rows  # masked edge block on the last step: still legal.


def _id_copy(x):
    n = x.size
    cols = _choose_cols(n)
    if cols is None:
        # No multiple-of-128 factor: the identity needs no data movement, so
        # returning x unchanged is exact semantics.
        return x

    rows = n // cols
    x2d = x.reshape(rows, cols)  # contiguous reshape: metadata only.

    itemsize = jnp.dtype(x.dtype).itemsize
    sub = _sublane_multiple(x.dtype)
    budget_rows = max(sub, (_TILE_BYTES_BUDGET // (cols * itemsize)) // sub * sub)
    tile_r = _choose_row_tile(rows, sub, budget_rows)

    y2d = pl.pallas_call(
        _copy_kernel,
        out_shape=jax.ShapeDtypeStruct((rows, cols), x2d.dtype),
        grid=(pl.cdiv(rows, tile_r),),
        in_specs=[pl.BlockSpec((tile_r, cols), lambda i: (i, 0))],
        out_specs=pl.BlockSpec((tile_r, cols), lambda i: (i, 0)),
        compiler_params=pltpu.CompilerParams(
            dimension_semantics=("parallel",),
            vmem_limit_bytes=_VMEM_LIMIT_BYTES,
        ),
        cost_estimate=pl.CostEstimate(
            flops=0, transcendentals=0, bytes_accessed=2 * n * itemsize),
    )(x2d)
    return y2d.reshape(x.shape)


# ---------------------------------------------------------------------------
# Public forward, matching the PyTorch `Id` module exactly.
# ---------------------------------------------------------------------------
_USE_ALIAS_PATH = True


def id_forward(x):
    """Identity forward pass: returns x with exact values, dtype and shape."""
    global _USE_ALIAS_PATH
    if x.ndim == 0 or x.size == 0:
        # Degenerate shapes: identity needs no kernel at all.
        return x
    if _USE_ALIAS_PATH:
        try:
            return _id_alias(x)
        except Exception:
            # Zero-copy aliased lowering unavailable; use the copy kernel.
            _USE_ALIAS_PATH = False
    return _id_copy(x)


if __name__ == "__main__":
    key = jax.random.PRNGKey(0)
    # Small NCHW input consistent with a conv-net feature map.
    x = jax.random.normal(key, (2, 4, 16, 16), dtype=jnp.float32)

    y = jax.block_until_ready(id_forward(x))

    assert y.shape == x.shape, (y.shape, x.shape)
    assert y.dtype == x.dtype, (y.dtype, x.dtype)
    assert bool(jnp.all(y == x)), "identity mismatch"

    print("KERNEL_OK")
</pallas_src>

<mosaic_0001>
module attributes {stable_mosaic.version = 11 : i64} {
  func.func @_id_alias_kernel(%arg0: memref<2x4x16x16xf32, #tpu.memory_space<any>>, %arg1: memref<2x4x16x16xf32, #tpu.memory_space<any>>) attributes {dimension_semantics = [], scalar_prefetch = 0 : i64, scratch_operands = 0 : i64, tpu.core_type = #tpu.core_type<tc>} {
    return
  }
}

module attributes {stable_mosaic.version = 11 : i64} {
  func.func @_copy_kernel(%arg0: i32, %arg1: memref<1x2048xf32, #tpu.memory_space<vmem>>, %arg2: memref<1x2048xf32, #tpu.memory_space<vmem>>) attributes {dimension_semantics = [#tpu.dimension_semantics<parallel>], iteration_bounds = array<i64: 1>, scalar_prefetch = 0 : i64, scratch_operands = 0 : i64, tpu.core_type = #tpu.core_type<tc>, window_params = [{transform_indices = @transform_0, window_bounds = array<i64: 1, 2048>}, {transform_indices = @transform_1, window_bounds = array<i64: 1, 2048>}]} {
    %c0 = arith.constant 0 : index
    %c0_0 = arith.constant 0 : index
    %0 = vector.load %arg1[%c0, %c0_0] : memref<1x2048xf32, #tpu.memory_space<vmem>>, vector<1x2048xf32>
    %c0_1 = arith.constant 0 : index
    %c0_2 = arith.constant 0 : index
    %1 = vector.load %arg2[%c0_1, %c0_2] : memref<1x2048xf32, #tpu.memory_space<vmem>>, vector<1x2048xf32>
    tpu.vector_store %arg2[%c0_1, %c0_2], %0 {strides = array<i32>} : memref<1x2048xf32, #tpu.memory_space<vmem>>, vector<1x2048xf32>,
    return
  }
  func.func @transform_0(%arg0: i32) -> (i32, i32) {
    %c0_i32 = arith.constant 0 : i32
    %c0_i32_0 = arith.constant 0 : i32
    return %arg0, %c0_i32 : i32, i32
  }
  func.func @transform_1(%arg0: i32) -> (i32, i32) {
    %c0_i32 = arith.constant 0 : i32
    %c0_i32_0 = arith.constant 0 : i32
    return %arg0, %c0_i32 : i32, i32
  }
}

</mosaic_0001>

<bundles_post_ra>
// kernel: tpu_custom_call.1
= control target key start
LH: loop header
LB: loop body
LE: loop exit
PB: predicated region body
PF: predicated region fallthrough
CT: control target
= control target key end

     0   :  { %s16_s0 = inlined_call_operand.hbm [shape: f32[2,4,16,16], index: 0, kind: input, shape index: {}, may-alias: {0,1}]   ;;  %s17_s1 = inlined_call_operand.hbm [shape: f32[2,4,16,16], index: 1, kind: output, shape index: {}, may-alias: {0,1}]  }

// kernel: tpu_custom_call.1
= control target key start
LH: loop header
LB: loop body
LE: loop exit
PB: predicated region body
PF: predicated region fallthrough
CT: control target
= control target key end

     0   :  { %6 = vsyncpa [#allocation3], 0  ;;  %s126_s0 = inlined_call_operand.hbm [shape: f32[1,2048], index: 0, kind: input, shape index: {}]   ;;  %s127_s1 = inlined_call_operand.hbm [shape: f32[1,2048], index: 1, kind: output, shape index: {}]  }
   0x1   :  { %7 = vsyncpa [#allocation4], 0  ;;  %s90_s6 = smov [#allocation2]   ;;  %s42_s10 = scalar_lea.hbm %s126_s0, 256 }
   0x2   :  { %s14_s7 = sshll.u32 %s90_s6, 4  ;;  %p43_p0 = scmp.ne.s32.totalorder %s126_s0, %s42_s10  ;;  %s15_s7 = int_to_ptr.vmem [resolvable:$true] %s14_s7 }
   0x3   :  { %p46_p1 = scmp.lt.u32.totalorder %s42_s10, %s126_s0 }
   0x5   :  { %p48_p2 = pnand %p46_p1, %p43_p0 }
   0x7   :  { %51 = shalt.err (!%p48_p2)
}
   0x8   :  { %s52_s15 = scalar_lea.vmem %s15_s7, 256  ;;  %p57_p4 = scmp.lt.s32.totalorder %s15_s7, %s15_s7 }
   0x9   :  { %p53_p3 = scmp.ne.s32.totalorder %s15_s7, %s52_s15  ;;  %p58_p5 = scmp.lt.s32.totalorder %s52_s15, %s52_s15 }
   0xb   :  { %p59_p6 = por %p58_p5, %p57_p4 }
   0xd   :  { %p60_p7 = pnand %p59_p6, %p53_p3 }
   0xf   :  { %63 = shalt.err (!%p60_p7)
}
  0x10   :  { %17 = dma.hbm_to_vmem [thread:$0]  %s126_s0, 256, %s15_s7, [#allocation3]  }
  0x11   :  { %86 = dma.done.wait [#allocation3], 256  }
  0x12   :  { %87 = vsyncadd [#allocation3], 4294967040  ;;  %s91_s18 = smov [#allocation5]   ;;  %v21_v0 = vld [vmem:[#allocation2] sm:$0xff]  ;;  %v22_v1 = vld [vmem:[#allocation2 + $0x8] sm:$0xff] }
  0x13   :  { %s31_s19 = sshll.u32 %s91_s18, 4  ;;  %23 = vst [vmem:[#allocation5] sm:$0xff] %v21_v0  ;;  %24 = vst [vmem:[#allocation5 + $0x8] sm:$0xff] %v22_v1  ;;  %s32_s19 = int_to_ptr.vmem [resolvable:$true] %s31_s19 }
  0x14   :  { %s64_s20 = scalar_lea.vmem %s32_s19, 256  ;;  %p69_p9 = scmp.lt.s32.totalorder %s32_s19, %s32_s19 }
  0x15   :  { %p65_p8 = scmp.ne.s32.totalorder %s32_s19, %s64_s20  ;;  %p70_p10 = scmp.lt.s32.totalorder %s64_s20, %s64_s20 }
  0x17   :  { %p71_p11 = por %p70_p10, %p69_p9 }
  0x19   :  { %p72_p12 = pnand %p71_p11, %p65_p8 }
  0x1b   :  { %75 = shalt.err (!%p72_p12)
}
  0x1c   :  { %s76_s0 = scalar_lea.hbm %s127_s1, 256 }
  0x1d   :  { %p77_p13 = scmp.ne.s32.totalorder %s127_s1, %s76_s0  ;;  %p80_p0 = scmp.lt.u32.totalorder %s76_s0, %s127_s1 }
  0x1f   :  { %p82_p1 = pnand %p80_p0, %p77_p13 }
  0x21   :  { %85 = shalt.err (!%p82_p1)
}
  0x22   :  { %34 = dma.vmem_to_hbm [thread:$0]  %s32_s19, 256, %s127_s1, [#allocation4]  }
  0x23   :  { %88 = dma.done.wait [#allocation4], 256  }
  0x24   :  { %89 = vsyncadd [#allocation4], 4294967040 }
  0x25   :  { %38 = vsyncpa [#allocation3], 1 }
  0x26   :  { %39 = vsyncpa [#allocation4], 1 }

</bundles_post_ra>
